<compile_context>
chip_gen: v7x
topology: tpu7x:2x2x1
jax: 0.10.0
libtpu: 0.0.40
codegen_flags: <defaults>
</compile_context>

<pallas_src>
import functools

import jax
import jax.numpy as jnp
from jax import lax
from jax.experimental import pallas as pl
from jax.experimental.pallas import tpu as pltpu


def _round_up(x, m):
    return (x + m - 1) // m * m


def proxynca_kernel(x_ref, p_ref, lbl_ref, w_ref, out_ref, *, scale):
    # x_ref:   (TILE_N, E)  input dtype (cast to f32 in-kernel)
    # p_ref:   (C, E)       bf16, already scale * l2-normalized (resident)
    # lbl_ref: (TILE_N, 1)  int32 class labels
    # w_ref:   (TILE_N, 1)  f32 per-sample weights (0 for padded rows)
    # out_ref: (1, 1, 128)  f32 partial weighted-loss sum for this tile
    eps = 1e-12  # F.normalize default eps

    x = x_ref[...].astype(jnp.float32)
    nrm = jnp.sqrt(jnp.sum(x * x, axis=-1, keepdims=True))        # (TILE_N, 1)
    inv = 1.0 / jnp.maximum(nrm, eps)
    xn = (scale * x) * inv                                        # f32

    # ||Xn_i||^2 without another (TILE_N, E) reduce; equals scale^2 unless the
    # row norm is below eps (matches the eps-guarded reference).
    x_sq = jnp.square(scale * nrm * inv)                          # (TILE_N, 1)
    p_sq = jnp.float32(scale * scale)                             # ||Pn_j||^2

    # MXU: contract over E directly (A @ B.T without materializing B.T).
    xp = lax.dot_general(
        xn.astype(jnp.bfloat16), p_ref[...],
        dimension_numbers=(((1,), (1,)), ((), ())),
        preferred_element_type=jnp.float32)                       # (TILE_N, C)

    d = jnp.maximum(x_sq + p_sq - 2.0 * xp, 0.0)                  # clamp(min=0)
    logits = -d

    # Numerically stable logsumexp over the class dim (f32).
    m = jnp.max(logits, axis=-1, keepdims=True)
    lse = m + jnp.log(jnp.sum(jnp.exp(logits - m), axis=-1, keepdims=True))

    # Select the target-column logit with an iota mask (no one-hot matrix).
    col = lax.broadcasted_iota(jnp.int32, logits.shape, 1)
    z_tgt = jnp.sum(jnp.where(col == lbl_ref[...], logits, 0.0),
                    axis=-1, keepdims=True)                       # (TILE_N, 1)

    # Per-row weighted cross-entropy, partial-summed over this tile.
    wloss = w_ref[...] * (lse - z_tgt)                            # (TILE_N, 1)
    partial = jnp.sum(wloss)
    out_ref[...] = jnp.broadcast_to(partial, out_ref.shape)

    # TODO(synk): for very large C, add an inner "arbitrary" grid axis over the
    # class dim with an online logsumexp so the (TILE_N, C) tile stays bounded.


def proxynca_prob_orig_reweight(X, T_labels, weights, proxies, scale):
    """Forward pass of ProxyNCA_prob_orig_reweight. Returns a scalar loss."""
    N, E = X.shape
    C = proxies.shape[0]
    scale = float(scale)

    # Normalize proxies once (plain XLA op), bf16 for the MXU / resident tile.
    p32 = proxies.astype(jnp.float32)
    p_nrm = jnp.sqrt(jnp.sum(p32 * p32, axis=-1, keepdims=True))
    p_n = ((scale * p32) / jnp.maximum(p_nrm, 1e-12)).astype(jnp.bfloat16)

    labels = jnp.asarray(T_labels, jnp.int32).reshape(N, 1)
    w = weights.reshape(N, 1).astype(jnp.float32)

    # Batch tiling: largest tile that keeps the working set comfortably inside
    # scoped VMEM on every generation (v7x has the smallest VMEM).
    tile_n = min(256, _round_up(N, 8))
    n_pad = _round_up(N, tile_n)
    num_tiles = n_pad // tile_n
    if n_pad != N:
        pad = n_pad - N
        X = jnp.pad(X, ((0, pad), (0, 0)))          # zero rows
        labels = jnp.pad(labels, ((0, pad), (0, 0)))
        w = jnp.pad(w, ((0, pad), (0, 0)))          # zero weight -> contributes 0

    xbytes = jnp.dtype(X.dtype).itemsize
    cost = pl.CostEstimate(
        flops=2 * n_pad * C * E + 8 * n_pad * C,
        transcendentals=n_pad * C + 2 * n_pad,
        bytes_accessed=(n_pad * E * xbytes + C * E * 2
                        + n_pad * 8 + num_tiles * 512),
    )

    kernel = functools.partial(proxynca_kernel, scale=scale)
    partials = pl.pallas_call(
        kernel,
        grid=(num_tiles,),
        in_specs=[
            pl.BlockSpec((tile_n, E), lambda i: (i, 0)),   # X tile
            pl.BlockSpec((C, E), lambda i: (0, 0)),        # proxies (resident)
            pl.BlockSpec((tile_n, 1), lambda i: (i, 0)),   # labels
            pl.BlockSpec((tile_n, 1), lambda i: (i, 0)),   # weights
        ],
        out_specs=pl.BlockSpec((1, 1, 128), lambda i: (i, 0, 0)),
        out_shape=jax.ShapeDtypeStruct((num_tiles, 1, 128), jnp.float32),
        compiler_params=pltpu.CompilerParams(
            dimension_semantics=("parallel",),
            vmem_limit_bytes=32 * 1024 * 1024,
        ),
        cost_estimate=cost,
    )(X, p_n, labels, w)

    # Mean over the true batch size (padded rows contributed exactly 0).
    return jnp.sum(partials[:, 0, 0]) / N


if __name__ == "__main__":
    key = jax.random.PRNGKey(0)
    k_proxy, k_x, k_t, k_w = jax.random.split(key, 4)

    nb_classes = 16
    sz_embed = 32
    scale = 3.0
    batch = 8

    # deterministic "parameter" init, mirrors torch.randn(nb_classes, sz_embed) / 8
    proxies = jax.random.normal(k_proxy, (nb_classes, sz_embed), jnp.float32) / 8.0

    X = jax.random.normal(k_x, (batch, sz_embed), jnp.float32)
    T = jax.random.randint(k_t, (batch,), 0, nb_classes, dtype=jnp.int32)
    weights = jax.random.uniform(k_w, (batch,), jnp.float32)

    loss = proxynca_prob_orig_reweight(X, T, weights, proxies, scale)
    jax.block_until_ready(loss)
    print("KERNEL_OK")
</pallas_src>

<mosaic_0001>
module attributes {stable_mosaic.version = 11 : i64} {
  func.func @proxynca_kernel(%arg0: i32, %arg1: memref<8x32xf32, #tpu.memory_space<vmem>>, %arg2: memref<16x32xbf16, #tpu.memory_space<vmem>>, %arg3: memref<8x1xi32, #tpu.memory_space<vmem>>, %arg4: memref<8x1xf32, #tpu.memory_space<vmem>>, %arg5: memref<1x1x128xf32, #tpu.memory_space<vmem>>) attributes {dimension_semantics = [#tpu.dimension_semantics<parallel>], iteration_bounds = array<i64: 1>, scalar_prefetch = 0 : i64, scratch_operands = 0 : i64, tpu.core_type = #tpu.core_type<tc>, window_params = [{transform_indices = @transform_0, window_bounds = array<i64: 8, 32>}, {pipeline_mode = #tpu.pipeline_mode<synchronous>, transform_indices = @transform_1, window_bounds = array<i64: 16, 32>}, {transform_indices = @transform_2, window_bounds = array<i64: 8, 1>}, {transform_indices = @transform_3, window_bounds = array<i64: 8, 1>}, {transform_indices = @transform_4, window_bounds = array<i64: 1, 1, 128>}]} {
    %c0 = arith.constant 0 : index
    %c0_0 = arith.constant 0 : index
    %0 = vector.load %arg1[%c0, %c0_0] : memref<8x32xf32, #tpu.memory_space<vmem>>, vector<8x32xf32>
    %1 = arith.mulf %0, %0 : vector<8x32xf32>
    %cst = arith.constant dense<0.000000e+00> : vector<8xf32>
    %2 = vector.multi_reduction <add>, %1, %cst [1] : vector<8x32xf32> to vector<8xf32>
    %3 = vector.shape_cast %2 : vector<8xf32> to vector<8x1xf32>
    %4 = math.sqrt %3 : vector<8x1xf32>
    %cst_1 = arith.constant 9.99999996E-13 : f32
    %5 = vector.broadcast %cst_1 : f32 to vector<8x1xf32>
    %6 = arith.maximumf %4, %5 : vector<8x1xf32>
    %cst_2 = arith.constant 1.000000e+00 : f32
    %7 = vector.broadcast %cst_2 : f32 to vector<8x1xf32>
    %8 = arith.divf %7, %6 : vector<8x1xf32>
    %cst_3 = arith.constant 3.000000e+00 : f32
    %9 = vector.broadcast %cst_3 : f32 to vector<8x32xf32>
    %10 = arith.mulf %9, %0 : vector<8x32xf32>
    %11 = vector.broadcast %8 : vector<8x1xf32> to vector<8x32xf32>
    %12 = arith.mulf %10, %11 : vector<8x32xf32>
    %cst_4 = arith.constant 3.000000e+00 : f32
    %13 = vector.broadcast %cst_4 : f32 to vector<8x1xf32>
    %14 = arith.mulf %13, %4 : vector<8x1xf32>
    %15 = arith.mulf %14, %8 : vector<8x1xf32>
    %16 = arith.mulf %15, %15 : vector<8x1xf32>
    %17 = arith.truncf %12 : vector<8x32xf32> to vector<8x32xbf16>
    %c0_5 = arith.constant 0 : index
    %c0_6 = arith.constant 0 : index
    %18 = vector.load %arg2[%c0_5, %c0_6] : memref<16x32xbf16, #tpu.memory_space<vmem>>, vector<16x32xbf16>
    %cst_7 = arith.constant dense<0.000000e+00> : vector<8x16xf32>
    %19 = tpu.matmul %17, %18, %cst_7 {dimension_numbers = #tpu.dot_dimension_numbers<[1], [1], [0], [0], [0, 0, 1, 0], [], []>} : vector<8x32xbf16>, vector<16x32xbf16>, vector<8x16xf32> -> vector<8x16xf32>
    %cst_8 = arith.constant 9.000000e+00 : f32
    %20 = vector.broadcast %cst_8 : f32 to vector<8x1xf32>
    %21 = arith.addf %16, %20 : vector<8x1xf32>
    %cst_9 = arith.constant 2.000000e+00 : f32
    %22 = vector.broadcast %cst_9 : f32 to vector<8x16xf32>
    %23 = arith.mulf %22, %19 : vector<8x16xf32>
    %24 = vector.broadcast %21 : vector<8x1xf32> to vector<8x16xf32>
    %25 = arith.subf %24, %23 : vector<8x16xf32>
    %cst_10 = arith.constant 0.000000e+00 : f32
    %26 = vector.broadcast %cst_10 : f32 to vector<8x16xf32>
    %27 = arith.maximumf %25, %26 : vector<8x16xf32>
    %cst_11 = arith.constant 0.000000e+00 : f32
    %28 = vector.broadcast %cst_11 : f32 to vector<8x16xf32>
    %29 = arith.subf %28, %27 : vector<8x16xf32>
    %cst_12 = arith.constant dense<0xFF800000> : vector<8xf32>
    %30 = vector.multi_reduction <maximumf>, %29, %cst_12 [1] : vector<8x16xf32> to vector<8xf32>
    %31 = vector.shape_cast %30 : vector<8xf32> to vector<8x1xf32>
    %32 = vector.broadcast %31 : vector<8x1xf32> to vector<8x16xf32>
    %33 = arith.subf %29, %32 : vector<8x16xf32>
    %34 = math.exp %33 : vector<8x16xf32>
    %cst_13 = arith.constant dense<0.000000e+00> : vector<8xf32>
    %35 = vector.multi_reduction <add>, %34, %cst_13 [1] : vector<8x16xf32> to vector<8xf32>
    %36 = vector.shape_cast %35 : vector<8xf32> to vector<8x1xf32>
    %37 = math.log %36 : vector<8x1xf32>
    %38 = arith.addf %31, %37 : vector<8x1xf32>
    %39 = tpu.iota {dimensions = array<i32: 1>} : vector<8x16xi32>
    %c0_14 = arith.constant 0 : index
    %c0_15 = arith.constant 0 : index
    %40 = vector.load %arg3[%c0_14, %c0_15] : memref<8x1xi32, #tpu.memory_space<vmem>>, vector<8x1xi32>
    %41 = vector.broadcast %40 : vector<8x1xi32> to vector<8x16xi32>
    %42 = arith.cmpi eq, %39, %41 : vector<8x16xi32>
    %cst_16 = arith.constant 0.000000e+00 : f32
    %43 = vector.broadcast %cst_16 : f32 to vector<8x16xf32>
    %44 = arith.select %42, %29, %43 : vector<8x16xi1>, vector<8x16xf32>
    %cst_17 = arith.constant dense<0.000000e+00> : vector<8xf32>
    %45 = vector.multi_reduction <add>, %44, %cst_17 [1] : vector<8x16xf32> to vector<8xf32>
    %46 = vector.shape_cast %45 : vector<8xf32> to vector<8x1xf32>
    %c0_18 = arith.constant 0 : index
    %c0_19 = arith.constant 0 : index
    %47 = vector.load %arg4[%c0_18, %c0_19] : memref<8x1xf32, #tpu.memory_space<vmem>>, vector<8x1xf32>
    %48 = arith.subf %38, %46 : vector<8x1xf32>
    %49 = arith.mulf %47, %48 : vector<8x1xf32>
    %50 = vector.shape_cast %49 : vector<8x1xf32> to vector<1x8x1xf32>
    %cst_20 = arith.constant dense<0.000000e+00> : vector<1xf32>
    %51 = vector.multi_reduction <add>, %50, %cst_20 [1, 2] : vector<1x8x1xf32> to vector<1xf32>
    %52 = vector.shape_cast %51 : vector<1xf32> to vector<1x1x1xf32>
    %53 = vector.extract %52[0, 0, 0] : f32 from vector<1x1x1xf32>
    %54 = vector.broadcast %53 : f32 to vector<1x1x128xf32>
    %c0_21 = arith.constant 0 : index
    %c0_22 = arith.constant 0 : index
    %c0_23 = arith.constant 0 : index
    %55 = vector.load %arg5[%c0_21, %c0_22, %c0_23] : memref<1x1x128xf32, #tpu.memory_space<vmem>>, vector<1x1x128xf32>
    tpu.vector_store %arg5[%c0_21, %c0_22, %c0_23], %54 {strides = array<i32>} : memref<1x1x128xf32, #tpu.memory_space<vmem>>, vector<1x1x128xf32>,
    return
  }
  func.func @transform_0(%arg0: i32) -> (i32, i32) {
    %c0_i32 = arith.constant 0 : i32
    %c0_i32_0 = arith.constant 0 : i32
    return %arg0, %c0_i32 : i32, i32
  }
  func.func @transform_1(%arg0: i32) -> (i32, i32) {
    %c0_i32 = arith.constant 0 : i32
    %c0_i32_0 = arith.constant 0 : i32
    %c0_i32_1 = arith.constant 0 : i32
    return %c0_i32, %c0_i32_0 : i32, i32
  }
  func.func @transform_2(%arg0: i32) -> (i32, i32) {
    %c0_i32 = arith.constant 0 : i32
    %c0_i32_0 = arith.constant 0 : i32
    return %arg0, %c0_i32 : i32, i32
  }
  func.func @transform_3(%arg0: i32) -> (i32, i32) {
    %c0_i32 = arith.constant 0 : i32
    %c0_i32_0 = arith.constant 0 : i32
    return %arg0, %c0_i32 : i32, i32
  }
  func.func @transform_4(%arg0: i32) -> (i32, i32, i32) {
    %c0_i32 = arith.constant 0 : i32
    %c0_i32_0 = arith.constant 0 : i32
    %c0_i32_1 = arith.constant 0 : i32
    return %arg0, %c0_i32, %c0_i32_0 : i32, i32, i32
  }
}

</mosaic_0001>

<bundles_post_ra>
// kernel: tpu_custom_call.1
= control target key start
LH: loop header
LB: loop body
LE: loop exit
PB: predicated region body
PF: predicated region fallthrough
CT: control target
= control target key end

     0   :  { %vm21_vm0 = vcmask 261120   ;;  %s260_s0 = inlined_call_operand.vmem [shape: f32[8,32], index: 0, kind: input, shape index: {}]   ;;  %s261_s1 = inlined_call_operand.vmem [shape: bf16[16,32], index: 1, kind: input, shape index: {}]   ;;  %s262_s2 = inlined_call_operand.vmem [shape: s32[8,1], index: 2, kind: input, shape index: {}]   ;;  %s263_s3 = inlined_call_operand.vmem [shape: f32[8,1], index: 3, kind: input, shape index: {}]   ;;  %s264_s4 = inlined_call_operand.hbm [shape: f32[1,1,128], index: 4, kind: output, shape index: {}]  }
   0x1   :  { %v19_v0 = vld [vmem:[%s260_s0] sm:$0xff] }
   0x2   :  { %v20_v1 = vmul.f32 %v19_v0, %v19_v0 }
   0x3   :  { %9 = vsyncpa [#allocation3], 0  ;;  %v171_v3 = vld [vmem:[%s261_s1] sm:$0xff]   ;;  %v204_v4 = vmov 0.0   ;;  %vm205_vm1 = vmmov 0   ;;  %v206_v7 = vmov 0   ;;  %v112_v22 = vlaneseq }
   0x4   :  { %v22_v2 = vsel %vm21_vm0, %v20_v1, 0.0  ;;  %157 = vmatprep.subr.bf16.mxu0 %v204_v4  ;;  %159 = vmatprep.mubr.msk.bf16.mxu0 %vm205_vm1, %v204_v4  ;;  %v52_v5 = vsel %vm21_vm0, %v171_v3, 0  ;;  %v114_v6 = vld [vmem:[%s262_s2] sm:$0xff]  ;;  %v35_v15 = vmul.f32 3.0, %v19_v0  ;;  %vm99_vm4 = vcmask 130048   ;;  %s207_s2 = smov [#allocation2]  }
   0x5   :  { %23 = vadd.xlane.f32.xlu0 %v22_v2  ;;  %158 = vmatpush3.bf16.xpose.msra.mxu0 %v52_v5  ;;  %v113_v30 = vand.u32 127, %v112_v22  ;;  %v123_v47 = vld [vmem:[%s263_s3] sm:$0xff]  ;;  %vm126_vm6 = vcmask 7168   ;;  %s145_s21 = sshll.u32 %s207_s2, 4  ;;  %s146_s21 = int_to_ptr.vmem [resolvable:$true] %s145_s21 }
   0x6   :  { %169 = vset.pattern.permute.xlu1 %v206_v7  ;;  %170 = vset.pattern.permute.xlu0 %v206_v7  ;;  %s180_s3 = scalar_lea.vmem %s146_s21, 16  ;;  %s184_s23 = scalar_lea.vmem %s146_s21, 32 }
   0x7   :  { %116 = vperm.xlu1 %169, %v114_v6   ;;  %p181_p0 = scmp.ne.s32.totalorder %s146_s21, %s180_s3  ;;  %p185_p1 = scmp.lt.s32.totalorder %s146_s21, %s146_s21 }
   0x8   :  { %p186_p2 = scmp.lt.s32.totalorder %s184_s23, %s180_s3 }
   0xa   :  { %p187_p3 = por %p186_p2, %p185_p1 }
   0xc   :  { %p188_p4 = pnand %p187_p3, %p181_p0 }
  0x86   :  { %v117_v31 = vpop.permute.xlu1 %116 }
  0x87   :  { %vm118_vm5 = vcmp.eq.s32.totalorder %v113_v30, %v117_v31 }
  0x92   :  { %v24_v8 = vpop.xlane.xlu0 %23 }
  0x93   :  { %172 = vrsqrt.f32 %v24_v8  ;;  %vm27_vm2 = vcmp.eq.f32.partialorder %v24_v8, inf  ;;  %v30_v11 = vand.u32 2147483648, %v24_v8  ;;  %vm29_vm3 = vcmp.eq.f32.partialorder %v24_v8, 0.0 }
  0x9d   :  { %v173_v9 = vpop.eup %172 }
  0x9e   :  { %v26_v10 = vmul.f32 %v173_v9, %v24_v8 }
  0xa0   :  { %v28_v12 = vsel %vm27_vm2, %v24_v8, %v26_v10 }
  0xa1   :  { %v31_v13 = vsel %vm29_vm3, %v30_v11, %v28_v12 }
  0xa2   :  { %v32_v14 = vmax.f32 %v31_v13, 1e-12  ;;  %v37_v16 = vmul.f32 3.0, %v31_v13 }
  0xa4   :  { %174 = vrcp.f32 %v32_v14 }
  0xae   :  { %v175_v17 = vpop.eup %174 }
  0xaf   :  { %v36_v18 = vmul.f32 %v175_v17, %v35_v15  ;;  %v38_v19 = vmul.f32 %v175_v17, %v37_v16 }
  0xb1   :  { %v40_v20 = vpack.c.bf16 %v36_v18, %v36_v18  ;;  %v39_v21 = vmul.f32 %v38_v19, %v38_v19 }
  0xb3   :  { %160 = vmatmul.mubr.msk.bf16.vlgmr.msra.gmra.mrb[0].mxu0 %vm21_vm0, %v40_v20  ;;  %v94_v24 = vadd.f32 9.0, %v39_v21 }
 0x186   :  { %v88_v23 = vpop.f32.mrb[0].mxu0 }
 0x187   :  { %v95_v25 = vmul.f32 2.0, %v88_v23  ;;  %v161_v26 = vpop.f32.mrb[1].mxu0 }
 0x188   :  { %v91_v27 = vpop.f32.mrb[2].mxu0 }
 0x189   :  { %v96_v28 = vsub.f32 %v94_v24, %v95_v25  ;;  %v162_v29 = vpop.f32.mrb[3].mxu0 }
 0x18b   :  { %v97_v32 = vmax.f32 %v96_v28, 0.0 }
 0x18d   :  { %v98_v33 = vsub.f32 0.0, %v97_v32 }
 0x18f   :  { %v100_v34 = vsel %vm99_vm4, %v98_v33, -inf  ;;  %v119_v35 = vsel %vm118_vm5, %v98_v33, 0.0 }
 0x190   :  { %101 = vmax.xlane.f32.xlu0 %v100_v34  ;;  %v120_v36 = vsel %vm99_vm4, %v119_v35, 0.0 }
 0x194   :  { %121 = vadd.xlane.f32.xlu0 %v120_v36 }
 0x21d   :  { %v102_v37 = vpop.xlane.xlu0 %101 }
 0x21e   :  { %v103_v38 = vsub.f32 %v98_v33, %v102_v37 }
 0x220   :  { %v104_v39 = vmul.f32 1.442695, %v103_v38 }
 0x221   :  { %v122_v46 = vpop.xlane.xlu0 %121 }
 0x222   :  { %176 = vpow2.f32 %v104_v39 }
 0x22c   :  { %v177_v40 = vpop.eup %176 }
 0x22d   :  { %v106_v41 = vsel %vm99_vm4, %v177_v40, 0.0 }
 0x22e   :  { %107 = vadd.xlane.f32.xlu1 %v106_v41 }
 0x2bb   :  { %v108_v42 = vpop.xlane.xlu1 %107 }
 0x2bc   :  { %178 = vlog2.f32 %v108_v42 }
 0x2c6   :  { %v179_v43 = vpop.eup %178 }
 0x2c7   :  { %v110_v44 = vmul.f32 0.6931472, %v179_v43 }
 0x2c9   :  { %v111_v45 = vadd.f32 %v110_v44, %v102_v37 }
 0x2cb   :  { %v124_v48 = vsub.f32 %v111_v45, %v122_v46 }
 0x2cd   :  { %v125_v49 = vmul.f32 %v124_v48, %v123_v47 }
 0x2cf   :  { %v127_v50 = vsel %vm126_vm6, %v125_v49, 0.0 }
 0x2d0   :  { %128 = vadd.xlane.f32.xlu0 %v127_v50 }
 0x35d   :  { %v129_v51 = vpop.xlane.xlu0 %128 }
 0x35e   :  { %v130_v52 = vrot.slane %v129_v51, 4 }
 0x360   :  { %v131_v53 = vadd.f32 %v130_v52, %v129_v51 }
 0x362   :  { %v132_v54 = vrot.slane %v131_v53, 2 }
 0x364   :  { %v133_v55 = vadd.f32 %v132_v54, %v131_v53 }
 0x366   :  { %v134_v56 = vrot.slane %v133_v55, 1 }
 0x368   :  { %v135_v57 = vadd.f32 %v134_v56, %v133_v55 }
 0x36a   :  { %163 = vpush %v135_v57 }
 0x39b   :  { %s164_s22 = spop %163 }
 0x39c   :  { %v137_v58 = vstv %s164_s22 }
 0x39d   :  { %138 = vst [vmem:[#allocation2] sm:$0x1] %v137_v58 }
 0x39e   :  { %191 = shalt.err (!%p188_p4)
}
 0x39f   :  { %s192_s26 = scalar_lea.hbm %s264_s4, 16 }
 0x3a0   :  { %p193_p5 = scmp.ne.s32.totalorder %s264_s4, %s192_s26  ;;  %p196_p6 = scmp.lt.u32.totalorder %s192_s26, %s264_s4 }
 0x3a2   :  { %p198_p7 = pnand %p196_p6, %p193_p5 }
 0x3a4   :  { %201 = shalt.err (!%p198_p7)
}
 0x3a5   :  { %148 = dma.vmem_to_hbm [thread:$0]  %s146_s21, 16, %s264_s4, [#allocation3]  }
 0x3a6   :  { %202 = dma.done.wait [#allocation3], 16  }
 0x3a7   :  { %203 = vsyncadd [#allocation3], 4294967280 }
 0x3a8   :  { %152 = vsyncpa [#allocation3], 1 }

</bundles_post_ra>
